<compile_context>
chip_gen: v6e
topology: v6e:2x2x1
jax: 0.10.0
libtpu: 0.0.40
codegen_flags: <defaults>
</compile_context>

<pallas_src>
import functools
import math

import numpy as np
import jax
import jax.numpy as jnp
from jax.experimental import pallas as pl
from jax.experimental.pallas import tpu as pltpu

# ---- module __init__ hyperparameters (deterministic, in-script) -------------
EPSILON = 36.0 / 255.0
ERR_QUANTILE = 0.1          # PolynomialScheduler(start_val=0.1, ...).val before update()
ADD_EPSILON = 0.1
ONESIDED = False
L = 1.0
LAMBDA = 0.01
DETACH_K = False            # only affects gradients, not the forward value


def _logit(y):
    return math.log(y / (1.0 - y))


CDF_LEFT = ERR_QUANTILE / 2.0
CDF_RIGHT = 1.0 - ERR_QUANTILE + ERR_QUANTILE / 2.0
Q = _logit(CDF_RIGHT) - _logit(CDF_LEFT)
SIGMA = 2.0 * EPSILON / Q   # NOTE: the PyTorch code reads `self.sigma`; the only
                            # consistent interpretation is the locally computed sigma.

TARGET_DELTA = 0.0 if ONESIDED else -ADD_EPSILON

_MAX_BLOCK_B = 512          # default batch tile; sweep 512-2048 on real shapes.
                            # 512 keeps 2x(block_b*C*4) + D*C*4 well inside the
                            # v7x 64 MiB / v5e 16 MiB-scoped VMEM budgets.


# ---- Pallas kernel -----------------------------------------------------------
def _cll_bce_kernel(wt_ref, pred_ref, tgt_ref, out_ref,
                    invd_ref, acc_ref, maxss_ref,
                    *, total_b, block_b, num_cls):
    # wt_ref:    (D, C) fc weight, transposed so class is the lane axis (resident)
    # pred_ref:  (block_b, C) logits tile (native (B, C) layout, streamed over B)
    # tgt_ref:   (block_b, 1) int32 class ids
    # out_ref:   (1, 1) f32 scalar loss in SMEM
    # invd_ref:  (1, C) f32 VMEM scratch: 1 / (Kfc * sigma) per class
    # acc_ref:   (1,)   f32 SMEM scratch: running sum of BCE terms
    # maxss_ref: (1,)   f32 SMEM scratch: max per-class sum of squares
    i = pl.program_id(0)

    @pl.when(i == 0)
    def _init():
        wt = wt_ref[...].astype(jnp.float32)                  # (D, C)
        # Per-class sum of squares: f32 VPU square + sublane reduce -> (1, C).
        row_ss = jnp.sum(wt * wt, axis=0, keepdims=True)
        # inv_denom = 1 / (Kfc * sigma) = rsqrt(sum(w^2)) / (L * sigma)
        # (row_ss == 0 still yields inf, matching the reference behavior.)
        invd_ref[...] = jax.lax.rsqrt(row_ss) * (1.0 / (L * SIGMA))
        acc_ref[0] = 0.0
        maxss_ref[0] = jnp.max(row_ss)

    pred = pred_ref[...].astype(jnp.float32)                  # (block_b, C)
    tgt = tgt_ref[...]                                        # (block_b, 1) int32
    inv_denom = invd_ref[...]                                 # (1, C)

    # is_target replaces torch scatter_: class index (lane) vs target (column).
    # NOTE: targets outside [0, C) give an all-zero one-hot row (PyTorch
    # scatter_ would raise); inputs are assumed valid.
    cls = jax.lax.broadcasted_iota(jnp.int32, (block_b, num_cls), 1)
    is_target = cls == tgt

    # Single-select softplus form of BCEWithLogits with one-hot labels:
    #   off-target: softplus(+x),  target: softplus(-x),  x = (pred+delta)*inv_denom
    y = jnp.where(is_target, -(pred + TARGET_DELTA), pred + ADD_EPSILON) * inv_denom
    bce = jnp.maximum(y, 0.0) + jnp.log1p(jnp.exp(-jnp.abs(y)))

    if total_b % block_b != 0:
        # Mask the padded remainder rows of the last batch tile.
        row = jax.lax.broadcasted_iota(jnp.int32, (block_b, num_cls), 0)
        bce = jnp.where(i * block_b + row < total_b, bce, 0.0)

    acc_ref[0] = acc_ref[0] + jnp.sum(bce)

    @pl.when(i == pl.num_programs(0) - 1)
    def _finalize():
        loss = acc_ref[0] * (1.0 / (total_b * num_cls))
        if LAMBDA != 0.0:
            # Kfc.max()^2 == L^2 * max(row_ss): no sqrt needed for the regularizer.
            loss = loss + (LAMBDA * L * L) * maxss_ref[0]
        out_ref[0, 0] = loss


@functools.partial(jax.jit, static_argnames=("block_b",))
def cll_bce(fc_weight, prediction, target, *, block_b=None):
    B, C = prediction.shape
    Cw, D = fc_weight.shape
    assert Cw == C, (Cw, C)

    if block_b is None:
        block_b = B if B <= _MAX_BLOCK_B else _MAX_BLOCK_B
    num_blocks = pl.cdiv(B, block_b)

    # Prediction stays in its native (B, C) layout — no extra HBM pass over the
    # streamed logits.  Only the small (C, D) fc weight is transposed so the
    # per-class norm reduces directly into a lane-dense (1, C) row in-kernel.
    w_t = fc_weight.T                                      # (D, C), tiny
    tgt = target.astype(jnp.int32).reshape(B, 1)           # (B, 1)

    kernel = functools.partial(_cll_bce_kernel,
                               total_b=B, block_b=block_b, num_cls=C)

    cost = pl.CostEstimate(
        flops=10 * B * C + 3 * D * C,
        transcendentals=2 * B * C,
        bytes_accessed=4 * (B * C + D * C + B + 1),
    )

    out = pl.pallas_call(
        kernel,
        out_shape=jax.ShapeDtypeStruct((1, 1), jnp.float32),
        grid=(num_blocks,),
        in_specs=[
            pl.BlockSpec((D, C), lambda i: (0, 0)),          # W^T: DMA'd once, resident
            pl.BlockSpec((block_b, C), lambda i: (i, 0)),    # logits tile, pipelined over B
            pl.BlockSpec((block_b, 1), lambda i: (i, 0)),    # target ids tile
        ],
        out_specs=pl.BlockSpec(memory_space=pltpu.MemorySpace.SMEM),
        scratch_shapes=[
            pltpu.VMEM((1, C), jnp.float32),   # inv_denom per class
            pltpu.SMEM((1,), jnp.float32),     # running BCE sum
            pltpu.SMEM((1,), jnp.float32),     # max per-class sum of squares
        ],
        compiler_params=pltpu.CompilerParams(
            dimension_semantics=("arbitrary",),  # B axis accumulates into SMEM scratch
        ),
        cost_estimate=cost,
    )(w_t, prediction, tgt)
    return out[0, 0]


# ---- numpy reference for correctness -----------------------------------------
def cll_bce_ref(w, p, t):
    B, C = p.shape
    kfc = np.linalg.norm(w, axis=1) * L
    delta = np.full_like(p, ADD_EPSILON)
    delta[np.arange(B), t] = TARGET_DELTA
    x = (p + delta) / (kfc * SIGMA)[None, :]
    z = np.zeros_like(p)
    z[np.arange(B), t] = 1.0
    bce = np.maximum(x, 0.0) - x * z + np.log1p(np.exp(-np.abs(x)))
    loss = bce.mean()
    if LAMBDA != 0.0:
        loss = loss + LAMBDA * kfc.max() ** 2
    return loss


if __name__ == "__main__":
    key = jax.random.PRNGKey(0)
    B, C, D = 8, 16, 32   # batch, num_classes, fc input dim (small synthetic shapes)
    kw, kp, kt = jax.random.split(key, 3)

    fc_weight = jax.random.normal(kw, (C, D), jnp.float32) * 0.1   # last-layer weight
    prediction = jax.random.normal(kp, (B, C), jnp.float32)        # logits
    target = jax.random.randint(kt, (B,), 0, C, jnp.int32)         # class labels

    loss = cll_bce(fc_weight, prediction, target)
    jax.block_until_ready(loss)
    ref = cll_bce_ref(np.asarray(fc_weight), np.asarray(prediction), np.asarray(target))
    assert np.allclose(float(loss), ref, rtol=1e-3, atol=1e-5), (float(loss), float(ref))

    # Second call exercising the multi-block batch grid + remainder masking path.
    B2 = 20
    kw2, kp2, kt2 = jax.random.split(jax.random.PRNGKey(1), 3)
    fc_weight2 = jax.random.normal(kw2, (C, D), jnp.float32) * 0.1
    prediction2 = jax.random.normal(kp2, (B2, C), jnp.float32)
    target2 = jax.random.randint(kt2, (B2,), 0, C, jnp.int32)

    loss2 = cll_bce(fc_weight2, prediction2, target2, block_b=8)   # grid=(3,), last block masked
    jax.block_until_ready(loss2)
    ref2 = cll_bce_ref(np.asarray(fc_weight2), np.asarray(prediction2), np.asarray(target2))
    assert np.allclose(float(loss2), ref2, rtol=1e-3, atol=1e-5), (float(loss2), float(ref2))

    print("KERNEL_OK")
</pallas_src>

<mosaic_0001>
module attributes {stable_mosaic.version = 11 : i64} {
  func.func @_cll_bce_kernel(%arg0: i32, %arg1: memref<32x16xf32, #tpu.memory_space<vmem>>, %arg2: memref<8x16xf32, #tpu.memory_space<vmem>>, %arg3: memref<8x1xi32, #tpu.memory_space<vmem>>, %arg4: memref<1x1xf32, #tpu.memory_space<smem>>, %arg5: memref<1x16xf32, #tpu.memory_space<vmem>>, %arg6: memref<1xf32, #tpu.memory_space<smem>>, %arg7: memref<1xf32, #tpu.memory_space<smem>>) attributes {dimension_semantics = [#tpu.dimension_semantics<arbitrary>], iteration_bounds = array<i64: 1>, scalar_prefetch = 0 : i64, scratch_operands = 3 : i64, tpu.core_type = #tpu.core_type<tc>, window_params = [{pipeline_mode = #tpu.pipeline_mode<synchronous>, transform_indices = @transform_0, window_bounds = array<i64: 32, 16>}, {transform_indices = @transform_1, window_bounds = array<i64: 8, 16>}, {transform_indices = @transform_2, window_bounds = array<i64: 8, 1>}, {transform_indices = @transform_3, window_bounds = array<i64: 1, 1>}]} {
    %c0_i32 = arith.constant 0 : i32
    %0 = arith.cmpi eq, %arg0, %c0_i32 : i32
    %1 = arith.extui %0 : i1 to i32
    %c0_i32_0 = arith.constant 0 : i32
    %2 = arith.cmpi ne, %1, %c0_i32_0 : i32
    scf.if %2 {
      %c0_15 = arith.constant 0 : index
      %c0_16 = arith.constant 0 : index
      %36 = vector.load %arg1[%c0_15, %c0_16] : memref<32x16xf32, #tpu.memory_space<vmem>>, vector<32x16xf32>
      %37 = arith.mulf %36, %36 : vector<32x16xf32>
      %cst_17 = arith.constant dense<0.000000e+00> : vector<16xf32>
      %38 = vector.multi_reduction <add>, %37, %cst_17 [0] : vector<32x16xf32> to vector<16xf32>
      %39 = vector.shape_cast %38 : vector<16xf32> to vector<1x16xf32>
      %40 = math.rsqrt %39 : vector<1x16xf32>
      %cst_18 = arith.constant 20.8564434 : f32
      %41 = vector.broadcast %cst_18 : f32 to vector<1x16xf32>
      %42 = arith.mulf %40, %41 : vector<1x16xf32>
      %c0_19 = arith.constant 0 : index
      %c0_20 = arith.constant 0 : index
      %43 = vector.load %arg5[%c0_19, %c0_20] : memref<1x16xf32, #tpu.memory_space<vmem>>, vector<1x16xf32>
      tpu.vector_store %arg5[%c0_19, %c0_20], %42 {strides = array<i32>} : memref<1x16xf32, #tpu.memory_space<vmem>>, vector<1x16xf32>,
      %cst_21 = arith.constant 0.000000e+00 : f32
      %c0_22 = arith.constant 0 : index
      %44 = memref.load %arg6[%c0_22] : memref<1xf32, #tpu.memory_space<smem>>
      memref.store %cst_21, %arg6[%c0_22] : memref<1xf32, #tpu.memory_space<smem>>
      %45 = vector.shape_cast %39 : vector<1x16xf32> to vector<1x1x16xf32>
      %cst_23 = arith.constant dense<0xFF800000> : vector<1xf32>
      %46 = vector.multi_reduction <maximumf>, %45, %cst_23 [1, 2] : vector<1x1x16xf32> to vector<1xf32>
      %47 = vector.shape_cast %46 : vector<1xf32> to vector<1x1x1xf32>
      %48 = vector.extract %47[0, 0, 0] : f32 from vector<1x1x1xf32>
      %c0_24 = arith.constant 0 : index
      %49 = memref.load %arg7[%c0_24] : memref<1xf32, #tpu.memory_space<smem>>
      memref.store %48, %arg7[%c0_24] : memref<1xf32, #tpu.memory_space<smem>>
    } else {
    }
    %c0 = arith.constant 0 : index
    %c0_1 = arith.constant 0 : index
    %3 = vector.load %arg2[%c0, %c0_1] : memref<8x16xf32, #tpu.memory_space<vmem>>, vector<8x16xf32>
    %c0_2 = arith.constant 0 : index
    %c0_3 = arith.constant 0 : index
    %4 = vector.load %arg3[%c0_2, %c0_3] : memref<8x1xi32, #tpu.memory_space<vmem>>, vector<8x1xi32>
    %c0_4 = arith.constant 0 : index
    %c0_5 = arith.constant 0 : index
    %5 = vector.load %arg5[%c0_4, %c0_5] : memref<1x16xf32, #tpu.memory_space<vmem>>, vector<1x16xf32>
    %6 = tpu.iota {dimensions = array<i32: 1>} : vector<8x16xi32>
    %7 = vector.broadcast %4 : vector<8x1xi32> to vector<8x16xi32>
    %8 = arith.cmpi eq, %6, %7 : vector<8x16xi32>
    %cst = arith.constant -1.000000e-01 : f32
    %9 = vector.broadcast %cst : f32 to vector<8x16xf32>
    %10 = arith.addf %3, %9 : vector<8x16xf32>
    %cst_6 = arith.constant 0.000000e+00 : f32
    %11 = vector.broadcast %cst_6 : f32 to vector<8x16xf32>
    %12 = arith.subf %11, %10 : vector<8x16xf32>
    %cst_7 = arith.constant 1.000000e-01 : f32
    %13 = vector.broadcast %cst_7 : f32 to vector<8x16xf32>
    %14 = arith.addf %3, %13 : vector<8x16xf32>
    %15 = arith.select %8, %12, %14 : vector<8x16xi1>, vector<8x16xf32>
    %16 = vector.broadcast %5 : vector<1x16xf32> to vector<8x16xf32>
    %17 = arith.mulf %15, %16 : vector<8x16xf32>
    %cst_8 = arith.constant 0.000000e+00 : f32
    %18 = vector.broadcast %cst_8 : f32 to vector<8x16xf32>
    %19 = arith.maximumf %17, %18 : vector<8x16xf32>
    %20 = math.absf %17 : vector<8x16xf32>
    %cst_9 = arith.constant 0.000000e+00 : f32
    %21 = vector.broadcast %cst_9 : f32 to vector<8x16xf32>
    %22 = arith.subf %21, %20 : vector<8x16xf32>
    %23 = math.exp %22 : vector<8x16xf32>
    %24 = math.log1p %23 : vector<8x16xf32>
    %25 = arith.addf %19, %24 : vector<8x16xf32>
    %c0_10 = arith.constant 0 : index
    %26 = memref.load %arg6[%c0_10] : memref<1xf32, #tpu.memory_space<smem>>
    %27 = vector.shape_cast %25 : vector<8x16xf32> to vector<1x8x16xf32>
    %cst_11 = arith.constant dense<0.000000e+00> : vector<1xf32>
    %28 = vector.multi_reduction <add>, %27, %cst_11 [1, 2] : vector<1x8x16xf32> to vector<1xf32>
    %29 = vector.shape_cast %28 : vector<1xf32> to vector<1x1x1xf32>
    %30 = vector.extract %29[0, 0, 0] : f32 from vector<1x1x1xf32>
    %31 = arith.addf %26, %30 : f32
    %c0_12 = arith.constant 0 : index
    %32 = memref.load %arg6[%c0_12] : memref<1xf32, #tpu.memory_space<smem>>
    memref.store %31, %arg6[%c0_12] : memref<1xf32, #tpu.memory_space<smem>>
    %c0_i32_13 = arith.constant 0 : i32
    %33 = arith.cmpi eq, %arg0, %c0_i32_13 : i32
    %34 = arith.extui %33 : i1 to i32
    %c0_i32_14 = arith.constant 0 : i32
    %35 = arith.cmpi ne, %34, %c0_i32_14 : i32
    scf.if %35 {
      %c0_15 = arith.constant 0 : index
      %36 = memref.load %arg6[%c0_15] : memref<1xf32, #tpu.memory_space<smem>>
      %cst_16 = arith.constant 7.812500e-03 : f32
      %37 = arith.mulf %36, %cst_16 : f32
      %c0_17 = arith.constant 0 : index
      %38 = memref.load %arg7[%c0_17] : memref<1xf32, #tpu.memory_space<smem>>
      %cst_18 = arith.constant 0.00999999977 : f32
      %39 = arith.mulf %cst_18, %38 : f32
      %40 = arith.addf %37, %39 : f32
      %c0_19 = arith.constant 0 : index
      %c0_20 = arith.constant 0 : index
      %41 = memref.load %arg4[%c0_19, %c0_20] : memref<1x1xf32, #tpu.memory_space<smem>>
      memref.store %40, %arg4[%c0_19, %c0_20] : memref<1x1xf32, #tpu.memory_space<smem>>
    } else {
    }
    return
  }
  func.func @transform_0(%arg0: i32) -> (i32, i32) {
    %c0_i32 = arith.constant 0 : i32
    %c0_i32_0 = arith.constant 0 : i32
    %c0_i32_1 = arith.constant 0 : i32
    return %c0_i32, %c0_i32_0 : i32, i32
  }
  func.func @transform_1(%arg0: i32) -> (i32, i32) {
    %c0_i32 = arith.constant 0 : i32
    %c0_i32_0 = arith.constant 0 : i32
    return %arg0, %c0_i32 : i32, i32
  }
  func.func @transform_2(%arg0: i32) -> (i32, i32) {
    %c0_i32 = arith.constant 0 : i32
    %c0_i32_0 = arith.constant 0 : i32
    return %arg0, %c0_i32 : i32, i32
  }
  func.func @transform_3(%arg0: i32) -> (i32, i32) {
    %c0_i32 = arith.constant 0 : i32
    %c0_i32_0 = arith.constant 0 : i32
    %c0_i32_1 = arith.constant 0 : i32
    return %c0_i32, %c0_i32_0 : i32, i32
  }
}

</mosaic_0001>

<bundles_post_ra>
// kernel: cll_bce.1
= control target key start
LH: loop header
LB: loop body
LE: loop exit
PB: predicated region body
PF: predicated region fallthrough
CT: control target
= control target key end

     0   :  { %vm27_vm0 = vcmask 130048   ;;  %v150_v3 = vmov 0   ;;  %s199_s0 = inlined_call_operand.vmem [shape: f32[32,16], index: 0, kind: input, shape index: {}]   ;;  %s200_s1 = inlined_call_operand.vmem [shape: f32[8,16], index: 1, kind: input, shape index: {}]   ;;  %s201_s2 = inlined_call_operand.vmem [shape: s32[8,1], index: 2, kind: input, shape index: {}]   ;;  %s202_s3 = inlined_call_operand.hbm [shape: f32[1,1], index: 3, kind: output, shape index: {}]  }
   0x1   :  { %v54_v0 = vld [vmem:[%s201_s2] sm:$0xff]  ;;  %v20_v2 = vld [vmem:[%s199_s0 + $0x8] sm:$0xff]  ;;  %133 = vset.pattern.permute.xlu0 %v150_v3  ;;  %v21_v4 = vld [vmem:[%s199_s0 + $0x10] sm:$0xff] }
   0x2   :  { %v19_v1 = vld [vmem:[%s199_s0] sm:$0xff]  ;;  %v22_v5 = vld [vmem:[%s199_s0 + $0x18] sm:$0xff]  ;;  %v24_v7 = vmul.f32 %v20_v2, %v20_v2  ;;  %59 = vperm.xlu0 %133, %v54_v0   ;;  %v25_v8 = vmul.f32 %v21_v4, %v21_v4 }
   0x3   :  { %v23_v6 = vmul.f32 %v19_v1, %v19_v1  ;;  %v26_v9 = vmul.f32 %v22_v5, %v22_v5 }
   0x4   :  { %8 = vsyncpa [#allocation6], 0  ;;  %v29_v11 = vsel %vm27_vm0, %v24_v7, 0.0  ;;  %v31_v13 = vsel %vm27_vm0, %v25_v8, 0.0  ;;  %vm43_vm1 = vcmask 122880   ;;  %v53_v26 = vld [vmem:[%s200_s1] sm:$0xff]  ;;  %v56_v27 = vlaneseq }
   0x5   :  { %v28_v10 = vsel %vm27_vm0, %v23_v6, 0.0  ;;  %v33_v14 = vsel %vm27_vm0, %v26_v9, 0.0  ;;  %v62_v28 = vadd.f32 -0.1, %v53_v26  ;;  %v64_v31 = vadd.f32 0.1, %v53_v26 }
   0x6   :  { %v30_v12 = vadd.f32 %v29_v11, %v28_v10  ;;  %v57_v29 = vand.u32 127, %v56_v27  ;;  %s151_s26 = smov [#allocation5]  }
   0x7   :  { %v63_v30 = vsub.f32 0.0, %v62_v28 }
   0x8   :  { %v32_v15 = vadd.f32 %v31_v13, %v30_v12 }
   0xa   :  { %v34_v16 = vadd.f32 %v33_v14, %v32_v15 }
   0xc   :  { %v35_v17 = vrot.slane %v34_v16, 4 }
   0xe   :  { %v36_v18 = vadd.f32 %v35_v17, %v34_v16 }
  0x10   :  { %v37_v19 = vrot.slane %v36_v18, 2 }
  0x12   :  { %v38_v20 = vadd.f32 %v37_v19, %v36_v18 }
  0x14   :  { %v39_v21 = vrot.slane %v38_v20, 1 }
  0x16   :  { %v40_v22 = vadd.f32 %v39_v21, %v38_v20 }
  0x18   :  { %134 = vrsqrt.f32 %v40_v22  ;;  %v47_v25 = vsel %vm27_vm0, %v40_v22, -inf }
  0x19   :  { %48 = vmax.xlane.f32.xlu1 %v47_v25 }
  0x25   :  { %v135_v23 = vpop.eup %134 }
  0x26   :  { %v42_v24 = vmul.f32 20.856443, %v135_v23 }
  0x28   :  { %44 = vst.msk [vmem:[#allocation2] sm:$0x1] %vm43_vm1, %v42_v24 }
  0x2f   :  { %v126_v33 = vld [vmem:[#allocation2] ss:$0 sm:$0xff] }
  0x7d   :  { %v60_v32 = vpop.permute.xlu0 %59 }
  0x7e   :  { %vm61_vm2 = vcmp.eq.s32.totalorder %v57_v29, %v60_v32 }
  0x7f   :  { %v65_v34 = vsel %vm61_vm2, %v63_v30, %v64_v31 }
  0x80   :  { %v72_v35 = vmul.f32 %v126_v33, %v65_v34 }
  0x82   :  { %v74_v36 = vand.u32 2147483647, %v72_v35  ;;  %v73_v47 = vmax.f32 %v72_v35, 0.0 }
  0x84   :  { %v75_v37 = vsub.f32 0.0, %v74_v36 }
  0x86   :  { %v76_v38 = vmul.f32 1.442695, %v75_v37 }
  0x88   :  { %136 = vpow2.f32 %v76_v38 }
  0x95   :  { %v137_v39 = vpop.eup %136 }
  0x96   :  { %v78_v40 = vadd.f32 1.0, %v137_v39  ;;  %v81_v41 = vmul.f32 -0.5, %v137_v39  ;;  %v84_v43 = vand.u32 2147483647, %v137_v39 }
  0x98   :  { %138 = vlog2.f32 %v78_v40  ;;  %v82_v42 = vadd.f32 1.0, %v81_v41  ;;  %vm85_vm3 = vcmp.lt.f32.partialorder %v84_v43, 0.0004427343 }
  0x9a   :  { %v83_v46 = vmul.f32 %v137_v39, %v82_v42 }
  0xa2   :  { %v49_v51 = vpop.xlane.xlu1 %48 }
  0xa3   :  { %127 = vpush %v49_v51 }
  0xa5   :  { %v139_v44 = vpop.eup %138 }
  0xa6   :  { %v80_v45 = vmul.f32 0.6931472, %v139_v44 }
  0xa8   :  { %v86_v48 = vsel %vm85_vm3, %v83_v46, %v80_v45 }
  0xa9   :  { %v87_v49 = vadd.f32 %v86_v48, %v73_v47 }
  0xab   :  { %v90_v50 = vsel %vm27_vm0, %v87_v49, 0.0 }
  0xac   :  { %91 = vadd.xlane.f32.xlu0 %v90_v50 }
  0xd4   :  { %s128_s1 = spop %127 }
  0xd5   :  { %s109_s22 = smul.f32 0.01, %s128_s1 }
 0x135   :  { %v92_v52 = vpop.xlane.xlu0 %91 }
 0x136   :  { %v93_v53 = vrot.slane %v92_v52, 4 }
 0x138   :  { %v94_v54 = vadd.f32 %v93_v53, %v92_v52 }
 0x13a   :  { %v95_v55 = vrot.slane %v94_v54, 2 }
 0x13c   :  { %v96_v56 = vadd.f32 %v95_v55, %v94_v54 }
 0x13e   :  { %v97_v57 = vrot.slane %v96_v56, 1 }
 0x140   :  { %v98_v58 = vadd.f32 %v97_v57, %v96_v56 }
 0x142   :  { %129 = vpush %v98_v58 }
 0x173   :  { %s130_s23 = spop %129 }
 0x174   :  { %s107_s24 = smul.f32 0.0078125, %s130_s23 }
 0x176   :  { %s110_s25 = sadd.f32 %s109_s22, %s107_s24 }
 0x178   :  { %112 = sst [smem:[#allocation5]] %s110_s25 }
 0x179   :  { %120 = dma.smem_to_hbm %s151_s26, 16, %s202_s3, [#allocation6]  }
 0x17a   :  { %148 = dma.done.wait [#allocation6], 16  }
 0x17b   :  { %149 = vsyncadd [#allocation6], 4294967280 }
 0x17c   :  { %124 = sfence }
 0x17d   :  { %125 = vsyncpa [#allocation6], 1 }

</bundles_post_ra>
